<compile_context>
chip_gen: v7x
topology: tpu7x:2x2x1
jax: 0.10.0
libtpu: 0.0.40
codegen_flags: <defaults>
</compile_context>

<pallas_src>
import jax
import jax.numpy as jnp
from jax.experimental import pallas as pl
from jax.experimental.pallas import tpu as pltpu

# ----------------------------- configuration ------------------------------
N_EMBD = 128          # lane-dense (multiple of 128)
INTERMEDIATE = 512    # lane-dense; tiled over TI chunks inside the kernel


# ------------------------------ math helpers -------------------------------
def _erf(x):
    """erf via Abramowitz & Stegun 7.1.26 (|err| <= 1.5e-7).

    Only exp/mul/add/div/select -> guaranteed Mosaic lowering; exp uses EUP.
    """
    p = 0.3275911
    a1, a2, a3, a4, a5 = (0.254829592, -0.284496736, 1.421413741,
                          -1.453152027, 1.061405429)
    sgn = jnp.where(x < 0.0, -1.0, 1.0)
    ax = jnp.abs(x)
    t = 1.0 / (1.0 + p * ax)
    poly = ((((a5 * t + a4) * t + a3) * t + a2) * t + a1) * t
    return sgn * (1.0 - poly * jnp.exp(-(ax * ax)))


def _gelu_exact(x):
    # Matches torch.nn.functional.gelu default (exact erf form) to ~1.5e-7.
    # TODO(synk): switch to jax.nn.gelu(approximate=True) if accuracy budget
    # allows (moves more work to EUP); kept exact for torch bit-parity.
    return 0.5 * x * (1.0 + _erf(x * 0.7071067811865476))


# ------------------------------- kernel ------------------------------------
def mlp_kernel(x_ref, wfc_ref, bfc_ref, wproj_ref, bproj_ref, o_ref, acc_ref):
    """One (row-tile, I-tile) step of fused fc -> GELU -> proj."""
    j = pl.program_id(1)                     # I-chunk index (innermost, "arbitrary")

    @pl.when(j == 0)
    def _init():
        acc_ref[...] = jnp.zeros_like(acc_ref)

    x = x_ref[...].astype(jnp.bfloat16)                           # (TM, C) bf16
    h = jnp.dot(x, wfc_ref[...], preferred_element_type=jnp.float32)
    h = h + bfc_ref[...]                                          # (TM, TI) f32
    h = _gelu_exact(h)
    acc_ref[...] += jnp.dot(h.astype(jnp.bfloat16), wproj_ref[...],
                            preferred_element_type=jnp.float32)   # (TM, C) f32

    @pl.when(j == pl.num_programs(1) - 1)
    def _finalize():
        o_ref[...] = (acc_ref[...] + bproj_ref[...]).astype(o_ref.dtype)


# ----------------------------- tile selection -------------------------------
def _pick_row_tile(m: int) -> int:
    """Multiple of 8, capped at 512; >=2 grid steps whenever possible so the
    'parallel' row axis keeps both v7x TensorCores busy."""
    cap = 512
    if m >= 2 * cap:
        return cap
    half = -(-m // 2)                     # ceil(m / 2)
    return max(8, -(-half // 8) * 8)      # round up to a multiple of 8


def _pick_i_tile(i: int) -> int:
    for cand in (256, 512, 128):
        if i % cand == 0:
            return cand
    return i                              # fallback: no I tiling for odd sizes


# ------------------------------- wrapper ------------------------------------
def gptneox_mlp_forward(x, params):
    """x: (B, T, C) float32 -> (B, T, C) float32."""
    B, T, C = x.shape
    M = B * T
    xf = x.reshape(M, C)

    # bf16 matmul operands (MXU-native); biases stay f32 (added in f32 accum).
    w_fc = params["w_fc"].astype(jnp.bfloat16)      # (C, I)
    b_fc = params["b_fc"].astype(jnp.float32)       # (1, I)
    w_proj = params["w_proj"].astype(jnp.bfloat16)  # (I, C)
    b_proj = params["b_proj"].astype(jnp.float32)   # (1, C)
    I = w_fc.shape[1]

    TM = _pick_row_tile(M)
    M_pad = -(-M // TM) * TM
    if M_pad != M:                                  # arbitrary B*T: pad rows
        xf = jnp.pad(xf, ((0, M_pad - M), (0, 0)))
    grid_rows = M_pad // TM

    TI = _pick_i_tile(I)
    grid_i = I // TI

    grid = (grid_rows, grid_i)            # ("parallel", "arbitrary"): reduction last

    in_specs = [
        pl.BlockSpec((TM, C), lambda i, j: (i, 0)),   # x row tile (resident over j)
        pl.BlockSpec((C, TI), lambda i, j: (0, j)),   # w_fc I-chunk
        pl.BlockSpec((1, TI), lambda i, j: (0, j)),   # b_fc I-chunk
        pl.BlockSpec((TI, C), lambda i, j: (j, 0)),   # w_proj I-chunk
        pl.BlockSpec((1, C), lambda i, j: (0, 0)),    # b_proj (constant index)
    ]
    out_specs = pl.BlockSpec((TM, C), lambda i, j: (i, 0))

    cost = pl.CostEstimate(
        flops=4 * M_pad * C * I,                      # two matmuls, 2*M*C*I each
        transcendentals=M_pad * I,                    # one exp per GELU element
        bytes_accessed=(xf.size * 4 + w_fc.size * 2 + b_fc.size * 4
                        + w_proj.size * 2 + b_proj.size * 4 + M_pad * C * 4),
    )

    out = pl.pallas_call(
        mlp_kernel,
        grid=grid,
        in_specs=in_specs,
        out_specs=out_specs,
        out_shape=jax.ShapeDtypeStruct((M_pad, C), x.dtype),
        scratch_shapes=[pltpu.VMEM((TM, C), jnp.float32)],
        compiler_params=pltpu.CompilerParams(
            dimension_semantics=("parallel", "arbitrary"),
            vmem_limit_bytes=48 * 1024 * 1024),       # above 32 MiB default, safe on v7x
        cost_estimate=cost,
    )(xf, w_fc, b_fc, w_proj, b_proj)

    return out[:M].reshape(B, T, C)


# ------------------------- pure-JAX references ------------------------------
def gptneox_mlp_reference(x, p):
    """Pure-f32 reference, mirrors the torch module exactly."""
    h = x @ p["w_fc"] + p["b_fc"][0]
    h = jax.nn.gelu(h, approximate=False)
    return h @ p["w_proj"] + p["b_proj"][0]


def gptneox_mlp_reference_bf16(x, p):
    """Reference matching the kernel numerics (bf16 operands, f32 accum)."""
    h = jnp.dot(x.astype(jnp.bfloat16), p["w_fc"].astype(jnp.bfloat16),
                preferred_element_type=jnp.float32) + p["b_fc"][0]
    h = jax.nn.gelu(h, approximate=False)
    return jnp.dot(h.astype(jnp.bfloat16), p["w_proj"].astype(jnp.bfloat16),
                   preferred_element_type=jnp.float32) + p["b_proj"][0]


# --------------------------------- main ------------------------------------
if __name__ == "__main__":
    key = jax.random.PRNGKey(0)
    ks = jax.random.split(key, 5)
    B, T = 2, 8
    x = jax.random.normal(ks[0], (B, T, N_EMBD), jnp.float32)
    params = {
        "w_fc": 0.02 * jax.random.normal(ks[1], (N_EMBD, INTERMEDIATE), jnp.float32),
        "b_fc": 0.02 * jax.random.normal(ks[2], (1, INTERMEDIATE), jnp.float32),
        "w_proj": 0.02 * jax.random.normal(ks[3], (INTERMEDIATE, N_EMBD), jnp.float32),
        "b_proj": 0.02 * jax.random.normal(ks[4], (1, N_EMBD), jnp.float32),
    }

    out = jax.block_until_ready(gptneox_mlp_forward(x, params))
    ref_bf16 = jax.block_until_ready(gptneox_mlp_reference_bf16(x, params))
    ref_f32 = jax.block_until_ready(gptneox_mlp_reference(x, params))

    assert out.shape == (B, T, N_EMBD) and out.dtype == jnp.float32
    err_bf16 = float(jnp.max(jnp.abs(out - ref_bf16)))
    err_f32 = float(jnp.max(jnp.abs(out - ref_f32)))
    # Tight vs. a reference with matching bf16-operand/f32-accum numerics,
    # loose vs. the pure-f32 torch-equivalent reference (bf16 operand rounding).
    assert jnp.allclose(out, ref_bf16, atol=2e-3, rtol=2e-3), err_bf16
    assert jnp.allclose(out, ref_f32, atol=5e-2, rtol=5e-2), err_f32
    print("KERNEL_OK")
</pallas_src>

<mosaic_0001>
module attributes {stable_mosaic.version = 11 : i64} {
  func.func @mlp_kernel(%arg0: i32, %arg1: i32, %arg2: memref<8x128xf32, #tpu.memory_space<vmem>>, %arg3: memref<128x256xbf16, #tpu.memory_space<vmem>>, %arg4: memref<1x256xf32, #tpu.memory_space<vmem>>, %arg5: memref<256x128xbf16, #tpu.memory_space<vmem>>, %arg6: memref<1x128xf32, #tpu.memory_space<vmem>>, %arg7: memref<8x128xf32, #tpu.memory_space<vmem>>, %arg8: memref<8x128xf32, #tpu.memory_space<vmem>>) attributes {dimension_semantics = [#tpu.dimension_semantics<parallel>, #tpu.dimension_semantics<arbitrary>], iteration_bounds = array<i64: 2, 2>, scalar_prefetch = 0 : i64, scratch_operands = 1 : i64, tpu.core_type = #tpu.core_type<tc>, window_params = [{transform_indices = @transform_0, window_bounds = array<i64: 8, 128>}, {transform_indices = @transform_1, window_bounds = array<i64: 128, 256>}, {transform_indices = @transform_2, window_bounds = array<i64: 1, 256>}, {transform_indices = @transform_3, window_bounds = array<i64: 256, 128>}, {pipeline_mode = #tpu.pipeline_mode<synchronous>, transform_indices = @transform_4, window_bounds = array<i64: 1, 128>}, {transform_indices = @transform_5, window_bounds = array<i64: 8, 128>}]} {
    %c0_i32 = arith.constant 0 : i32
    %0 = arith.cmpi eq, %arg1, %c0_i32 : i32
    %1 = arith.extui %0 : i1 to i32
    %c0_i32_0 = arith.constant 0 : i32
    %2 = arith.cmpi ne, %1, %c0_i32_0 : i32
    scf.if %2 {
      %cst_30 = arith.constant 0.000000e+00 : f32
      %60 = vector.broadcast %cst_30 : f32 to vector<8x128xf32>
      %c0_31 = arith.constant 0 : index
      %c0_32 = arith.constant 0 : index
      %61 = vector.load %arg8[%c0_31, %c0_32] : memref<8x128xf32, #tpu.memory_space<vmem>>, vector<8x128xf32>
      tpu.vector_store %arg8[%c0_31, %c0_32], %60 {strides = array<i32>} : memref<8x128xf32, #tpu.memory_space<vmem>>, vector<8x128xf32>,
    } else {
    }
    %c0 = arith.constant 0 : index
    %c0_1 = arith.constant 0 : index
    %3 = vector.load %arg2[%c0, %c0_1] : memref<8x128xf32, #tpu.memory_space<vmem>>, vector<8x128xf32>
    %4 = arith.truncf %3 : vector<8x128xf32> to vector<8x128xbf16>
    %c0_2 = arith.constant 0 : index
    %c0_3 = arith.constant 0 : index
    %5 = vector.load %arg3[%c0_2, %c0_3] : memref<128x256xbf16, #tpu.memory_space<vmem>>, vector<128x256xbf16>
    %cst = arith.constant dense<0.000000e+00> : vector<8x256xf32>
    %6 = tpu.matmul %4, %5, %cst {dimension_numbers = #tpu.dot_dimension_numbers<[1], [0], [0], [1], [0, 0, 1, 1], [], []>} : vector<8x128xbf16>, vector<128x256xbf16>, vector<8x256xf32> -> vector<8x256xf32>
    %c0_4 = arith.constant 0 : index
    %c0_5 = arith.constant 0 : index
    %7 = vector.load %arg4[%c0_4, %c0_5] : memref<1x256xf32, #tpu.memory_space<vmem>>, vector<1x256xf32>
    %8 = vector.broadcast %7 : vector<1x256xf32> to vector<8x256xf32>
    %9 = arith.addf %6, %8 : vector<8x256xf32>
    %cst_6 = arith.constant 5.000000e-01 : f32
    %10 = vector.broadcast %cst_6 : f32 to vector<8x256xf32>
    %11 = arith.mulf %10, %9 : vector<8x256xf32>
    %cst_7 = arith.constant 0.707106769 : f32
    %12 = vector.broadcast %cst_7 : f32 to vector<8x256xf32>
    %13 = arith.mulf %9, %12 : vector<8x256xf32>
    %cst_8 = arith.constant 0.000000e+00 : f32
    %14 = vector.broadcast %cst_8 : f32 to vector<8x256xf32>
    %15 = arith.cmpf olt, %13, %14 : vector<8x256xf32>
    %cst_9 = arith.constant -1.000000e+00 : f32
    %cst_10 = arith.constant 1.000000e+00 : f32
    %16 = vector.broadcast %cst_9 : f32 to vector<8x256xf32>
    %17 = vector.broadcast %cst_10 : f32 to vector<8x256xf32>
    %18 = arith.select %15, %16, %17 : vector<8x256xi1>, vector<8x256xf32>
    %19 = math.absf %13 : vector<8x256xf32>
    %cst_11 = arith.constant 0.327591091 : f32
    %20 = vector.broadcast %cst_11 : f32 to vector<8x256xf32>
    %21 = arith.mulf %20, %19 : vector<8x256xf32>
    %cst_12 = arith.constant 1.000000e+00 : f32
    %22 = vector.broadcast %cst_12 : f32 to vector<8x256xf32>
    %23 = arith.addf %22, %21 : vector<8x256xf32>
    %cst_13 = arith.constant 1.000000e+00 : f32
    %24 = vector.broadcast %cst_13 : f32 to vector<8x256xf32>
    %25 = arith.divf %24, %23 : vector<8x256xf32>
    %cst_14 = arith.constant 1.06140542 : f32
    %26 = vector.broadcast %cst_14 : f32 to vector<8x256xf32>
    %27 = arith.mulf %26, %25 : vector<8x256xf32>
    %cst_15 = arith.constant -1.45315206 : f32
    %28 = vector.broadcast %cst_15 : f32 to vector<8x256xf32>
    %29 = arith.addf %27, %28 : vector<8x256xf32>
    %30 = arith.mulf %29, %25 : vector<8x256xf32>
    %cst_16 = arith.constant 1.42141378 : f32
    %31 = vector.broadcast %cst_16 : f32 to vector<8x256xf32>
    %32 = arith.addf %30, %31 : vector<8x256xf32>
    %33 = arith.mulf %32, %25 : vector<8x256xf32>
    %cst_17 = arith.constant -0.284496725 : f32
    %34 = vector.broadcast %cst_17 : f32 to vector<8x256xf32>
    %35 = arith.addf %33, %34 : vector<8x256xf32>
    %36 = arith.mulf %35, %25 : vector<8x256xf32>
    %cst_18 = arith.constant 0.254829586 : f32
    %37 = vector.broadcast %cst_18 : f32 to vector<8x256xf32>
    %38 = arith.addf %36, %37 : vector<8x256xf32>
    %39 = arith.mulf %38, %25 : vector<8x256xf32>
    %40 = arith.mulf %19, %19 : vector<8x256xf32>
    %cst_19 = arith.constant 0.000000e+00 : f32
    %41 = vector.broadcast %cst_19 : f32 to vector<8x256xf32>
    %42 = arith.subf %41, %40 : vector<8x256xf32>
    %43 = math.exp %42 : vector<8x256xf32>
    %44 = arith.mulf %39, %43 : vector<8x256xf32>
    %cst_20 = arith.constant 1.000000e+00 : f32
    %45 = vector.broadcast %cst_20 : f32 to vector<8x256xf32>
    %46 = arith.subf %45, %44 : vector<8x256xf32>
    %47 = arith.mulf %18, %46 : vector<8x256xf32>
    %cst_21 = arith.constant 1.000000e+00 : f32
    %48 = vector.broadcast %cst_21 : f32 to vector<8x256xf32>
    %49 = arith.addf %48, %47 : vector<8x256xf32>
    %50 = arith.mulf %11, %49 : vector<8x256xf32>
    %c0_22 = arith.constant 0 : index
    %c0_23 = arith.constant 0 : index
    %51 = vector.load %arg8[%c0_22, %c0_23] : memref<8x128xf32, #tpu.memory_space<vmem>>, vector<8x128xf32>
    %52 = arith.truncf %50 : vector<8x256xf32> to vector<8x256xbf16>
    %c0_24 = arith.constant 0 : index
    %c0_25 = arith.constant 0 : index
    %53 = vector.load %arg5[%c0_24, %c0_25] : memref<256x128xbf16, #tpu.memory_space<vmem>>, vector<256x128xbf16>
    %cst_26 = arith.constant dense<0.000000e+00> : vector<8x128xf32>
    %54 = tpu.matmul %52, %53, %cst_26 {dimension_numbers = #tpu.dot_dimension_numbers<[1], [0], [0], [1], [0, 0, 1, 1], [], []>} : vector<8x256xbf16>, vector<256x128xbf16>, vector<8x128xf32> -> vector<8x128xf32>
    %55 = arith.addf %51, %54 : vector<8x128xf32>
    %c0_27 = arith.constant 0 : index
    %c0_28 = arith.constant 0 : index
    %56 = vector.load %arg8[%c0_27, %c0_28] : memref<8x128xf32, #tpu.memory_space<vmem>>, vector<8x128xf32>
    tpu.vector_store %arg8[%c0_27, %c0_28], %55 {strides = array<i32>} : memref<8x128xf32, #tpu.memory_space<vmem>>, vector<8x128xf32>,
    %c1_i32 = arith.constant 1 : i32
    %57 = arith.cmpi eq, %arg1, %c1_i32 : i32
    %58 = arith.extui %57 : i1 to i32
    %c0_i32_29 = arith.constant 0 : i32
    %59 = arith.cmpi ne, %58, %c0_i32_29 : i32
    scf.if %59 {
      %c0_30 = arith.constant 0 : index
      %c0_31 = arith.constant 0 : index
      %60 = vector.load %arg8[%c0_30, %c0_31] : memref<8x128xf32, #tpu.memory_space<vmem>>, vector<8x128xf32>
      %c0_32 = arith.constant 0 : index
      %c0_33 = arith.constant 0 : index
      %61 = vector.load %arg6[%c0_32, %c0_33] : memref<1x128xf32, #tpu.memory_space<vmem>>, vector<1x128xf32>
      %62 = vector.broadcast %61 : vector<1x128xf32> to vector<8x128xf32>
      %63 = arith.addf %60, %62 : vector<8x128xf32>
      %c0_34 = arith.constant 0 : index
      %c0_35 = arith.constant 0 : index
      %64 = vector.load %arg7[%c0_34, %c0_35] : memref<8x128xf32, #tpu.memory_space<vmem>>, vector<8x128xf32>
      tpu.vector_store %arg7[%c0_34, %c0_35], %63 {strides = array<i32>} : memref<8x128xf32, #tpu.memory_space<vmem>>, vector<8x128xf32>,
    } else {
    }
    return
  }
  func.func @transform_0(%arg0: i32, %arg1: i32) -> (i32, i32) {
    %c0_i32 = arith.constant 0 : i32
    %c0_i32_0 = arith.constant 0 : i32
    return %arg0, %c0_i32 : i32, i32
  }
  func.func @transform_1(%arg0: i32, %arg1: i32) -> (i32, i32) {
    %c0_i32 = arith.constant 0 : i32
    %c0_i32_0 = arith.constant 0 : i32
    return %c0_i32, %arg1 : i32, i32
  }
  func.func @transform_2(%arg0: i32, %arg1: i32) -> (i32, i32) {
    %c0_i32 = arith.constant 0 : i32
    %c0_i32_0 = arith.constant 0 : i32
    return %c0_i32, %arg1 : i32, i32
  }
  func.func @transform_3(%arg0: i32, %arg1: i32) -> (i32, i32) {
    %c0_i32 = arith.constant 0 : i32
    %c0_i32_0 = arith.constant 0 : i32
    return %arg1, %c0_i32 : i32, i32
  }
  func.func @transform_4(%arg0: i32, %arg1: i32) -> (i32, i32) {
    %c0_i32 = arith.constant 0 : i32
    %c0_i32_0 = arith.constant 0 : i32
    %c0_i32_1 = arith.constant 0 : i32
    return %c0_i32, %c0_i32_0 : i32, i32
  }
  func.func @transform_5(%arg0: i32, %arg1: i32) -> (i32, i32) {
    %c0_i32 = arith.constant 0 : i32
    %c0_i32_0 = arith.constant 0 : i32
    return %arg0, %c0_i32 : i32, i32
  }
}

</mosaic_0001>

<bundles_post_ra>
// kernel: tpu_custom_call.1
= control target key start
LH: loop header
LB: loop body
LE: loop exit
PB: predicated region body
PF: predicated region fallthrough
CT: control target
= control target key end

     0   :  { %s1798_s0 = inlined_call_operand.hbm [shape: f32[16,128], index: 0, kind: input, shape index: {}]   ;;  %s1799_s1 = inlined_call_operand.hbm [shape: bf16[128,512], index: 1, kind: input, shape index: {}]   ;;  %s1800_s2 = inlined_call_operand.vmem [shape: f32[1,512], index: 2, kind: input, shape index: {}]   ;;  %s1801_s3 = inlined_call_operand.hbm [shape: bf16[512,128], index: 3, kind: input, shape index: {}]   ;;  %s1802_s4 = inlined_call_operand.vmem [shape: f32[1,128], index: 4, kind: input, shape index: {}]   ;;  %s1803_s5 = inlined_call_operand.hbm [shape: f32[16,128], index: 5, kind: output, shape index: {}]  }
   0x1   :  { %1814 = sst [smem:[#allocation20_spill]] %s1799_s1 }
   0x2   :  { %1815 = sst [smem:[#allocation21_spill]] %s1800_s2 }
   0x3   :  { %1816 = sst [smem:[#allocation22_spill]] %s1802_s4 }
   0x4   :  { %1817 = sst [smem:[#allocation23_spill]] %s1803_s5 }
   0x5   :  { %10 = vsyncpa [#allocation4], 0 }
   0x6   :  { %12 = vsyncpa [#allocation4 + $0x1], 0 }
   0x7   :  { %13 = vsyncpa [#allocation7], 0 }
   0x8   :  { %15 = vsyncpa [#allocation7 + $0x1], 0 }
   0x9   :  { %16 = vsyncpa [#allocation5], 0 }
   0xa   :  { %18 = vsyncpa [#allocation5 + $0x1], 0  ;;  %s1404_s18 = smov 0   ;;  %s1406_s19 = smov 0  }
   0xb   :  { %s1408_s20 = smov 0   ;;  %s1410_s21 = smov 0  }
   0xc   :  { %s1412_s22 = smov 0   ;;  %s1414_s23 = smov 0  }
   0xd   :  { %s1416_s24 = smov 0   ;;  %s1418_s25 = smov 0  }
   0xe   :  { %s1420_s26 = smov 0   ;;  %s1422_s27 = smov 0  }
   0xf   :  { %s1424_s28 = smov 0  }
  0x10 LB: > { %1818 = sst [smem:[#allocation13_spill]] %s1340_s23  ;;  %p51_p0 = scmp.eq.s32.totalorder %s1360_s28, 0  ;;  %s1360_s28 = sphi %s1424_s28, %s24_s28   ;;  %s1356_s27 = sphi %s1422_s27, %s1853_s27   ;;  %s1352_s26 = sphi %s1420_s26, %s1860_s26   ;;  %s1348_s25 = sphi %s1418_s25, %s1851_s25   ;;  %s1344_s24 = sphi %s1416_s24, %s1859_s24   ;;  %s1340_s23 = sphi %s1414_s23, %s1850_s23   ;;  %s1336_s22 = sphi %s1412_s22, %s1858_s22   ;;  %s1332_s21 = sphi %s1410_s21, %s1857_s21   ;;  %s1328_s20 = sphi %s1408_s20, %s1856_s20   ;;  %s1324_s19 = sphi %s1406_s19, %s1855_s19   ;;  %s1320_s18 = sphi %s1404_s18, %s1854_s18  }
  0x11   : > { %1819 = sst [smem:[#allocation14_spill]] %s1348_s25  ;;  %p76_p1 = scmp.ne.s32.totalorder %s1328_s20, %s1324_s19 }
  0x12   : > { %1820 = sst [smem:[#allocation15_spill]] %s1356_s27  ;;  %p1804_p2 = scmp.lt.s32.totalorder %s1360_s28, 4 }
  0x13   : > { %s226_s30 = sand.u32 1, %s1360_s28   ;;  %p78_p3 = por %p76_p1, %p51_p0 }
  0x14   : > { %s228_s6 = sand.u32 1, %s1328_s20   ;;  %s952_s7 = sshll.u32 %s1352_s26, 7 }
  0x15   : > { %s1469_s8 = sshll.u32 %s228_s6, 7  ;;  %s1821_s1 = sld [smem:[#allocation20_spill]] }
  0x16   : > { %p1478_p4 = pnand %p1804_p2, %p78_p3  ;;  %s230_s13 = scalar_lea.vmem [#allocation6], %s1469_s8 }
  0x17   : > { %s237_s14 = sshll.u32 %s230_s13, 4  ;;  %s1485_s15 = scalar_lea.sflag [#allocation7], %s226_s30  ;;  %s1483_s14 = int_to_ptr.vmem [resolvable:$true] %s237_s14 }
  0x18   : > { %p1807_p6 = pneg %p1478_p4 }
  0x1b   : > { %s1474_s11 = scalar_lea.hbm %s1821_s1, %s952_s7  ;;  %s1149_s7 = scalar_lea.hbm %s1821_s1, 4096 }
  0x1c   : > { %s1144_s16 = scalar_lea.hbm %s1474_s11, 2048  ;;  %p1150_p9 = scmp.lt.u32.totalorder %s1474_s11, %s1821_s1 }
  0x1d   : > { %p1145_p5 = scmp.ne.s32.totalorder %s1474_s11, %s1144_s16  ;;  %p1151_p10 = scmp.lt.u32.totalorder %s1149_s7, %s1144_s16 }
  0x1e   : > { %p1153_p12 = scmp.lt.u32.totalorder %s1144_s16, %s1474_s11 }
  0x1f   : > { %p1147_p7 = pnand %p1807_p6, %p1145_p5  ;;  %p1152_p11 = por %p1151_p10, %p1150_p9 }
  0x21   : > { %p1148_p8 = pneg %p1147_p7  ;;  %p1154_p13 = por %p1153_p12, %p1152_p11 }
  0x23   : > { %p1155_p1 = pnand %p1154_p13, %p1148_p8 }
  0x25   : > { %1158 = shalt.err (!%p1155_p1)
}
  0x26   : > { %s1159_s30 = scalar_lea.vmem %s1483_s14, 2048  ;;  %s1362_s13 = smov [#allocation6]  }
  0x27   : > { %p1160_p3 = scmp.ne.s32.totalorder %s1483_s14, %s1159_s30  ;;  %s1164_s17 = sshll.u32 %s1362_s13, 4  ;;  %s1165_s17 = int_to_ptr.vmem [resolvable:$false] %s1164_s17 }
  0x28   : > { %s1166_s6 = scalar_lea.vmem %s1165_s17, 4096  ;;  %p1167_p2 = scmp.lt.s32.totalorder %s1483_s14, %s1165_s17 }
  0x29   : > { %p1162_p5 = pnand %p1160_p3, %p1807_p6  ;;  %p1168_p9 = scmp.lt.s32.totalorder %s1166_s6, %s1159_s30 }
  0x2b   : > { %p1163_p7 = pneg %p1162_p5  ;;  %p1169_p10 = por %p1168_p9, %p1167_p2 }
  0x2d   : > { %p1170_p11 = pnand %p1169_p10, %p1163_p7 }
  0x2f   : > { %1173 = shalt.err (!%p1170_p11)
}
  0x30   : > { %s1363_s16 = smov 256   ;;  %s1364_s7 = smov 128  }
  0x31   : > { %s1365_s9 = smov 8   ;;  %p907_p2 = scmp.ge.s32.totalorder %s1360_s28, 1 }
  0x32   : > { %990 = dma.hbm_to_vmem [thread:$0]  (!%p1478_p4), %s1474_s11, 2048, %s1483_s14, %s1485_s15, %s1363_s16, %s1364_s7, %s1365_s9  }
  0x33   : > { %p274_p8 = scmp.lt.s32.totalorder %s1360_s28, 5  ;;  %s1520_s30 = sadd.s32 4294967295, %s1360_s28  }
  0x34   : > { %s896_s13 = sadd.s32 4294967294, %s1360_s28   ;;  %s33_s17 = sadd.s32 1, %s1352_s26 }
  0x35   : > { %p1515_p12 = pnand %p907_p2, %p274_p8  ;;  %p34_p13 = scmp.ge.s32.totalorder %s33_s17, 2 }
  0x36   : > { %s36_s6 = sadd.s32 1, %s1356_s27  ;;  %s43_s11 = sadd.s32 1, %s1340_s23 }
  0x37   : > { %s1823_s10 = scalar_select %p1515_p12, 1, 0 }
  0x38   : > { %p50_p1 = scmp.ne.s32.totalorder %s1340_s23, %s1336_s22  ;;  %s1862_s17 = smov (%p34_p13, %s33_s17), 0 }
  0x39   : > { %1824 = sst [smem:[#allocation16_spill]] %s1862_s17  ;;  %s1864_s6 = smov (!%p34_p13, %s36_s6), %s1356_s27 }
  0x3a   : > { %p1536_p3 = por %p51_p0, %p50_p1  ;;  %p56_p5 = scmp.ne.s32.totalorder %s1336_s22, %s1332_s21 }
  0x3b   : > { %p38_p7 = scmp.ge.s32.totalorder %s1864_s6, 2  ;;  %p57_p9 = scmp.eq.s32.totalorder %s1520_s30, 0 }
  0x3c   : > { %s66_s16 = ssub.s32 %s1352_s26, %s1862_s17  ;;  %p82_p10 = scmp.ne.s32.totalorder %s1324_s19, %s1320_s18 }
  0x3d   : > { %s1866_s6 = smov (%p38_p7, %s1864_s6), 0  ;;  %p1552_p11 = por %p57_p9, %p56_p5 }
  0x3e   : > { %1826 = sst [smem:[#allocation17_spill]] %s1866_s6  ;;  %p67_p0 = scmp.eq.s32.totalorder %s66_s16, 0 }
  0x3f   : > { %s1827_s7 = scalar_select %p1552_p11, 1, 0 }
  0x40   : > { %s40_s9 = ssub.s32 %s1356_s27, %s1866_s6  ;;  %p1558_p2 = por %p82_p10, %p57_p9 }
  0x41   : > { %p41_p8 = scmp.eq.s32.totalorder %s40_s9, 0  ;;  %p179_p13 = scmp.eq.s32.totalorder %s1520_s30, 3 }
  0x42   : > { %s1828_s29 = scalar_select %p1558_p2, 1, 0 }
  0x43   : > { %s1829_s1 = sadd.s32 1, %s1328_s20  ;;  %p1574_p7 = por %p179_p13, %p50_p1 }
  0x44   : > { %s1566_s18 = scalar_select %p67_p0, %s1328_s20, %s1829_s1  }
  0x45   : > { %s1569_s17 = scalar_select %p41_p8, %s1340_s23, %s43_s11  }
  0x46   : > { %1830 = sst [smem:[#allocation18_spill]] %s1566_s18  ;;  %p185_p6 = scmp.eq.s32.totalorder %s896_s13, 3 }
  0x47   : > { %1831 = sst [smem:[#allocation19_spill]] %s1569_s17  ;;  %s208_s25 = sand.u32 1, %s1340_s23  }
  0x48   : > { %s1832_s5 = scalar_select %p1574_p7, 1, 0 }
  0x49   : > { %s900_s16 = sshll.u32 %s1356_s27, 7  ;;  %p1583_p9 = por %p185_p6, %p56_p5 }
  0x4a   : > { %s899_s9 = sshll.u32 %s208_s25, 3  ;;  %s1590_s1 = scalar_lea.hbm %s1798_s0, %s900_s16 }
  0x4b   : > { %s1833_s6 = scalar_select %p1583_p9, 1, 0 }
  0x4c   : > { %p1834_p10 = scmp.lt.s32.totalorder %s1360_s28, 4  ;;  %s212_s11 = scalar_lea.vmem [#allocation3], %s899_s9 }
  0x4d   : > { %s219_s27 = sshll.u32 %s212_s11, 4  ;;  %s209_s17 = scalar_lea.sflag [#allocation4], %s208_s25  ;;  %s1600_s27 = int_to_ptr.vmem [resolvable:$true] %s219_s27 }
  0x4e   : > { %p1596_p1 = pnand %p1834_p10, %p1536_p3  ;;  %s1174_s2 = scalar_lea.hbm %s1590_s1, 128 }
  0x4f   : > { %p1175_p6 = scmp.ne.s32.totalorder %s1590_s1, %s1174_s2  ;;  %s1179_s16 = scalar_lea.hbm %s1798_s0, 256 }
  0x50   : > { %p1176_p5 = pneg %p1596_p1  ;;  %p1180_p3 = scmp.lt.u32.totalorder %s1590_s1, %s1798_s0 }
  0x51   : > { %p1181_p13 = scmp.lt.u32.totalorder %s1179_s16, %s1174_s2  ;;  %p1183_p9 = scmp.lt.u32.totalorder %s1174_s2, %s1590_s1 }
  0x52   : > { %p1177_p0 = pnand %p1176_p5, %p1175_p6 }
  0x53   : > { %p1182_p10 = por %p1181_p13, %p1180_p3 }
  0x54   : > { %p1178_p8 = pneg %p1177_p0 }
  0x55   : > { %p1184_p7 = por %p1183_p9, %p1182_p10 }
  0x57   : > { %p1185_p2 = pnand %p1184_p7, %p1178_p8 }
  0x59   : > { %1188 = shalt.err (!%p1185_p2)
}
  0x5a   : > { %s1189_s25 = scalar_lea.vmem %s1600_s27, 128  ;;  %s1366_s9 = smov [#allocation3]  }
  0x5b   : > { %p1190_p6 = scmp.ne.s32.totalorder %s1600_s27, %s1189_s25  ;;  %s1194_s11 = sshll.u32 %s1366_s9, 4  ;;  %s1195_s11 = int_to_ptr.vmem [resolvable:$false] %s1194_s11 }
  0x5c   : > { %s1196_s23 = scalar_lea.vmem %s1195_s11, 256  ;;  %p1197_p12 = scmp.lt.s32.totalorder %s1600_s27, %s1195_s11 }
  0x5d   : > { %p1192_p0 = pnand %p1190_p6, %p1176_p5  ;;  %p1198_p3 = scmp.lt.s32.totalorder %s1196_s23, %s1189_s25 }
  0x5f   : > { %p1193_p11 = pneg %p1192_p0  ;;  %p1199_p13 = por %p1198_p3, %p1197_p12 }
  0x61   : > { %p1200_p9 = pnand %p1199_p13, %p1193_p11 }
  0x63   : > { %1203 = shalt.err (!%p1200_p9)
}
  0x64   : > { %987 = dma.hbm_to_vmem [thread:$0]  (!%p1596_p1), %s1590_s1, 128, %s1600_s27, %s209_s17  }
  0x65   : > { %s953_s18 = sshll.u32 %s1352_s26, 11  ;;  %s259_s2 = scalar_lea.vmem [#allocation8], %s1469_s8 }
  0x66   : > { %s266_s4 = sshll.u32 %s259_s2, 4  ;;  %s1632_s9 = scalar_lea.hbm %s1801_s3, %s953_s18  ;;  %s1634_s4 = int_to_ptr.vmem [resolvable:$true] %s266_s4 }
  0x67   : > { %s1204_s13 = scalar_lea.hbm %s1632_s9, 2048  ;;  %p1836_p11 = pneg %p1478_p4 }
  0x68   : > { %p1205_p12 = scmp.ne.s32.totalorder %s1632_s9, %s1204_s13  ;;  %s1209_s17 = scalar_lea.hbm %s1801_s3, 4096 }
  0x69   : > { %p1210_p1 = scmp.lt.u32.totalorder %s1632_s9, %s1801_s3  ;;  %p1211_p5 = scmp.lt.u32.totalorder %s1209_s17, %s1204_s13 }
  0x6a   : > { %p1207_p2 = pnand %p1205_p12, %p1836_p11  ;;  %p1213_p10 = scmp.lt.u32.totalorder %s1204_s13, %s1632_s9 }
  0x6b   : > { %p1212_p8 = por %p1211_p5, %p1210_p1 }
  0x6c   : > { %p1208_p7 = pneg %p1207_p2 }
  0x6d   : > { %p1214_p6 = por %p1213_p10, %p1212_p8 }
  0x6f   : > { %p1215_p0 = pnand %p1214_p6, %p1208_p7 }
  0x71   : > { %1218 = shalt.err (!%p1215_p0)
}
  0x72   : > { %s1219_s11 = scalar_lea.vmem %s1634_s4, 2048  ;;  %p1837_p13 = pmov %p1836_p11 }
  0x73   : > { %p1220_p3 = scmp.ne.s32.totalorder %s1634_s4, %s1219_s11  ;;  %s1367_s23 = smov [#allocation8]  }
  0x74   : > { %s1224_s18 = sshll.u32 %s1367_s23, 4  ;;  %s1225_s18 = int_to_ptr.vmem [resolvable:$false] %s1224_s18 }
  0x75   : > { %p1222_p9 = pnand %p1220_p3, %p1837_p13  ;;  %s1226_s2 = scalar_lea.vmem %s1225_s18, 4096 }
  0x76   : > { %p1227_p11 = scmp.lt.s32.totalorder %s1634_s4, %s1225_s18  ;;  %p1228_p2 = scmp.lt.s32.totalorder %s1226_s2, %s1219_s11 }
  0x77   : > { %p1223_p12 = pneg %p1222_p9 }
  0x78   : > { %p1229_p1 = por %p1228_p2, %p1227_p11 }
  0x7a   : > { %p1230_p5 = pnand %p1229_p1, %p1223_p12 }
  0x7c   : > { %1233 = shalt.err (!%p1230_p5)
}
  0x7d   : > { %s1368_s14 = smov 64   ;;  %s1369_s16 = smov 4  }
  0x7e   : > { %993 = dma.hbm_to_vmem [thread:$0]  (!%p1478_p4), %s1632_s9, 2048, %s1634_s4, %s1485_s15, %s1368_s14, %s1368_s14, %s1369_s16  }
  0x7f   : > { %p1838_p7 = scmp.ne.s32.totalorder %s1823_s10, 0 }
  0x80   : > { %s1663_s13 = sand.u32 (!%p1838_p7), 1, %s1336_s22   ;;  %p1839_p8 = scmp.ne.s32.totalorder (!%p1838_p7), %s1827_s7, 0 }
  0x81   : > { %278 = sbr.rel (%p1838_p7) target bundleno = 706 (0x2c2), region = 40  ;;  %s908_s27 = sshll.u32 (!%p1838_p7), %s1663_s13, 3 }
  0x82   : > { %s281_s8 = scalar_lea.sflag (!%p1838_p7), [#allocation4], %s1663_s13  ;;  %s1667_s17 = scalar_lea.vmem (!%p1838_p7), [#allocation3], %s908_s27 }
  0x88   : > { %1307 = dma.done.wait (%p1839_p8), %s281_s8, 128  }
  0x89   : > { %1309 = vsyncadd (%p1839_p8), %s281_s8, 4294967168  ;;  %s289_s12 = sand.u32 1, %s1520_s30   ;;  %s291_s15 = sand.u32 1, %s1324_s19  }
  0x8a   : > { %s909_s10 = sshll.u32 %s291_s15, 7  ;;  %s290_s4 = scalar_lea.sflag [#allocation7], %s289_s12 }
  0x8b   : > { %s1675_s9 = scalar_lea.vmem [#allocation6], %s909_s10  ;;  %p1840_p4 = scmp.ne.s32.totalorder %s1828_s29, 0 }
  0x8d   : > { %1311 = dma.done.wait (%p1840_p4), %s290_s4, 4096  }
  0x8e   : > { %1313 = vsyncadd (%p1840_p4), %s290_s4, 4294963200  ;;  %s912_s1 = sshll.u32 %s1344_s24, 1  ;;  %s1841_s11 = sld [smem:[#allocation21_spill]] }
  0x8f   : > { %p345_p10 = scmp.lt.s32.totalorder %s912_s1, 3  ;;  %s1688_s23 = scalar_lea.vmem [#allocation8], %s909_s10 }
  0x90   : > { %s1690_s18 = scalar_lea.vmem [#allocation9], %s908_s27  ;;  %p913_p6 = scmp.ne.s32.totalorder %s1344_s24, 0 }
  0x91   : > { %s1868_s1 = smov (!%p345_p10, %s912_s1), 3  ;;  %v1370_v0 = vmov (!%p913_p6), 0.0  }
  0x92   : > { %354 = sbr.rel (%p913_p6) target bundleno = 153 (0x99), region = 56  ;;  %355 = vst [vmem:[#allocation2] sm:$0xff] (!%p913_p6), %v1370_v0 }
  0x94   : > { %s347_s30 = scalar_lea.vmem %s1841_s11, %s1868_s1 }
  0x99 PF: > { %v1096_v1 = vld [vmem:[%s1675_s9 + $0x4] ss:$8 sps:$4 sm:$0xff]   ;;  %v1098_v2 = vld [vmem:[%s1675_s9] ss:$8 sps:$4 sm:$0xff]   ;;  %v1371_v3 = vmov 0   ;;  %v356_v18 = vld [vmem:[%s1667_s17] sm:$0xff]  ;;  %v376_v36 = vlaneseq }
  0x9a   : > { %498 = vmatprep.mubr.bf16.mxu0 %v1371_v3  ;;  %466 = vmatprep.subr.bf16.mxu0 %v1096_v1  ;;  %v1099_v4 = vld [vmem:[%s1675_s9 + $0x14] ss:$8 sps:$4 sm:$0xff]   ;;  %v1101_v5 = vld [vmem:[%s1675_s9 + $0x10] ss:$8 sps:$4 sm:$0xff]   ;;  %v1102_v6 = vld [vmem:[%s1675_s9 + $0x24] ss:$8 sps:$4 sm:$0xff]   ;;  %v357_v19 = vpack.c.bf16 %v356_v18, %v356_v18 }
  0x9b   : > { %467 = vmatpush1.bf16.msra.mxu0 %v1098_v2  ;;  %v1104_v7 = vld [vmem:[%s1675_s9 + $0x20] ss:$8 sps:$4 sm:$0xff]   ;;  %v1105_v8 = vld [vmem:[%s1675_s9 + $0x34] ss:$8 sps:$4 sm:$0xff]   ;;  %v1107_v9 = vld [vmem:[%s1675_s9 + $0x30] ss:$8 sps:$4 sm:$0xff]  }
  0x9c   : > { %468 = vmatprep.subr.bf16.mxu0 %v1099_v4  ;;  %v1108_v10 = vld [vmem:[%s1675_s9 + $0x44] ss:$8 sps:$4 sm:$0xff]   ;;  %v1110_v11 = vld [vmem:[%s1675_s9 + $0x40] ss:$8 sps:$4 sm:$0xff]   ;;  %v1111_v12 = vld [vmem:[%s1675_s9 + $0x54] ss:$8 sps:$4 sm:$0xff]  }
  0x9d   : > { %v1113_v13 = vld [vmem:[%s1675_s9 + $0x50] ss:$8 sps:$4 sm:$0xff]   ;;  %v1114_v14 = vld [vmem:[%s1675_s9 + $0x64] ss:$8 sps:$4 sm:$0xff]   ;;  %v1116_v15 = vld [vmem:[%s1675_s9 + $0x60] ss:$8 sps:$4 sm:$0xff]  }
  0x9e   : > { %v1117_v16 = vld [vmem:[%s1675_s9 + $0x74] ss:$8 sps:$4 sm:$0xff]   ;;  %v1119_v17 = vld [vmem:[%s1675_s9 + $0x70] ss:$8 sps:$4 sm:$0xff]   ;;  %v1120_v20 = vld [vmem:[%s1688_s23 + $0x40] sm:$0xff]   ;;  %v377_v37 = vshrl.u32 %v376_v36, 7 }
  0x9f   : > { %469 = vmatpush1.bf16.msra.mxu0 %v1101_v5  ;;  %v1121_v21 = vld [vmem:[%s1688_s23] sm:$0xff]   ;;  %v1122_v22 = vld [vmem:[%s1688_s23 + $0x48] sm:$0xff]   ;;  %954 = vmatprep.subr.bf16.mxu1 %v1120_v20  ;;  %v1124_v24 = vld [vmem:[%s1688_s23 + $0x50] sm:$0xff]   ;;  %p946_p0 = scmp.ne.s32.totalorder %s1344_s24, 1 }
  0xa0   : > { %470 = vmatprep.subr.bf16.mxu0 %v1102_v6  ;;  %955 = vmatpush3.bf16.msra.mxu1 %v1121_v21  ;;  %v1123_v23 = vld [vmem:[%s1688_s23 + $0x8] sm:$0xff]   ;;  %v1125_v25 = vld [vmem:[%s1688_s23 + $0x10] sm:$0xff]   ;;  %v1126_v26 = vld [vmem:[%s1688_s23 + $0x58] sm:$0xff]   ;;  %v378_v38 = vsub.s32 0, %v377_v37  ;;  %v382_v40 = vsub.s32 1, %v377_v37  ;;  %s1843_s8 = sld [smem:[#allocation22_spill]] (!%p946_p0) }
  0xa1   : > { %956 = vmatprep.subr.bf16.mxu1 %v1122_v22  ;;  %v1127_v27 = vld [vmem:[%s1688_s23 + $0x18] sm:$0xff]   ;;  %v1128_v28 = vld [vmem:[%s1688_s23 + $0x60] sm:$0xff]   ;;  %v1130_v30 = vld [vmem:[%s1688_s23 + $0x68] sm:$0xff]  }
  0xa2   : > { %v1129_v29 = vld [vmem:[%s1688_s23 + $0x20] sm:$0xff]   ;;  %v1131_v31 = vld [vmem:[%s1688_s23 + $0x28] sm:$0xff]   ;;  %v1132_v32 = vld [vmem:[%s1688_s23 + $0x70] sm:$0xff]  }
  0xa3   : > { %471 = vmatpush1.bf16.msra.mxu0 %v1104_v7  ;;  %v1133_v33 = vld [vmem:[%s1688_s23 + $0x30] sm:$0xff]   ;;  %v1134_v34 = vld [vmem:[%s1688_s23 + $0x78] sm:$0xff]   ;;  %v374_v39 = vld [vmem:[%s347_s30] sm:$0x3] }
  0xa4   : > { %472 = vmatprep.subr.bf16.mxu0 %v1105_v8  ;;  %957 = vmatpush3.bf16.msra.mxu1 %v1123_v23  ;;  %v1135_v35 = vld [vmem:[%s1688_s23 + $0x38] sm:$0xff]   ;;  %v379_v41 = vrot.slane %v374_v39, %v378_v38  ;;  %v383_v42 = vrot.slane %v374_v39, %v382_v40  ;;  %v561_v39 = vld [vmem:[#allocation2] sm:$0xff] }
  0xa5   : > { %958 = vmatprep.subr.bf16.mxu1 %v1124_v24  ;;  %v1372_v24 = vmov 1.0  }
  0xa7   : > { %473 = vmatpush1.bf16.msra.mxu0 %v1107_v9 }
  0xa8   : > { %474 = vmatprep.subr.bf16.mxu0 %v1108_v10  ;;  %959 = vmatpush3.bf16.msra.mxu1 %v1125_v25 }
  0xa9   : > { %960 = vmatprep.subr.bf16.mxu1 %v1126_v26 }
  0xab   : > { %475 = vmatpush1.bf16.msra.mxu0 %v1110_v11 }
  0xac   : > { %476 = vmatprep.subr.bf16.mxu0 %v1111_v12  ;;  %961 = vmatpush3.bf16.msra.mxu1 %v1127_v27 }
  0xad   : > { %962 = vmatprep.subr.bf16.mxu1 %v1128_v28 }
  0xaf   : > { %477 = vmatpush1.bf16.msra.mxu0 %v1113_v13 }
  0xb0   : > { %478 = vmatprep.subr.bf16.mxu0 %v1114_v14  ;;  %963 = vmatpush3.bf16.msra.mxu1 %v1129_v29 }
  0xb1   : > { %964 = vmatprep.subr.bf16.mxu1 %v1130_v30 }
  0xb3   : > { %479 = vmatpush1.bf16.msra.mxu0 %v1116_v15 }
  0xb4   : > { %480 = vmatprep.subr.bf16.mxu0 %v1117_v16  ;;  %965 = vmatpush3.bf16.msra.mxu1 %v1131_v31 }
  0xb5   : > { %966 = vmatprep.subr.bf16.mxu1 %v1132_v32 }
  0xb7   : > { %481 = vmatpush1.bf16.msra.mxu0 %v1119_v17 }
  0xb8   : > { %967 = vmatpush3.bf16.msra.mxu1 %v1133_v33 }
  0xb9   : > { %968 = vmatprep.subr.bf16.mxu1 %v1134_v34 }
  0xba   : > { %499 = vmatmul.mubr.bf16.vlgmr.msra.gmra.mrb[0].mxu0 %v357_v19 }
  0xbc   : > { %969 = vmatpush3.bf16.msra.mxu1 %v1135_v35 }
 0x18d   : > { %v500_v43 = vpop.f32.mrb[0].mxu0 }
 0x18e   : > { %v501_v44 = vadd.f32 %v500_v43, %v379_v41  ;;  %v502_v45 = vpop.f32.mrb[1].mxu0 }
 0x18f   : > { %v503_v46 = vadd.f32 %v502_v45, %v383_v42  ;;  %v504_v47 = vpop.f32.mrb[2].mxu0 }
 0x190   : > { %v509_v48 = vmul.f32 0.70710677, %v501_v44  ;;  %v505_v49 = vpop.f32.mrb[3].mxu0  ;;  %v507_v30 = vmul.f32 0.5, %v501_v44 }
 0x191   : > { %v510_v50 = vmul.f32 0.70710677, %v503_v46  ;;  %v508_v32 = vmul.f32 0.5, %v503_v46  ;;  %v947_v46 = vld [vmem:[%s1843_s8] ss:$0 sm:$0xff] (!%p946_p0) }
 0x192   : > { %v515_v51 = vand.u32 2147483647, %v509_v48  ;;  %vm511_vm0 = vcmp.lt.f32.partialorder %v509_v48, 0.0 }
 0x193   : > { %v516_v52 = vand.u32 2147483647, %v510_v50  ;;  %vm512_vm1 = vcmp.lt.f32.partialorder %v510_v50, 0.0  ;;  %v513_v25 = vsel %vm511_vm0, -1.0, %v1372_v24 }
 0x194   : > { %v517_v53 = vmul.f32 0.3275911, %v515_v51  ;;  %v543_v57 = vmul.f32 %v515_v51, %v515_v51  ;;  %v514_v27 = vsel %vm512_vm1, -1.0, %v1372_v24 }
 0x195   : > { %v518_v54 = vmul.f32 0.3275911, %v516_v52  ;;  %v544_v58 = vmul.f32 %v516_v52, %v516_v52 }
 0x196   : > { %v519_v55 = vadd.f32 1.0, %v517_v53  ;;  %v545_v60 = vsub.f32 0.0, %v543_v57 }
 0x197   : > { %v520_v56 = vadd.f32 1.0, %v518_v54  ;;  %v546_v62 = vsub.f32 0.0, %v544_v58 }
 0x198   : > { %1136 = vrcp.f32 %v519_v55  ;;  %v547_v2 = vmul.f32 1.442695, %v545_v60 }
 0x199   : > { %1138 = vrcp.f32 %v520_v56  ;;  %v549_v4 = vmul.f32 1.442695, %v546_v62 }
 0x19a   : > { %1140 = vpow2.f32 %v547_v2 }
 0x19b   : > { %1142 = vpow2.f32 %v549_v4 }
 0x1a2   : > { %v1137_v59 = vpop.eup %1136 }
 0x1a3   : > { %v1139_v61 = vpop.eup %1138  ;;  %v525_v63 = vmul.f32 1.0614054, %v1137_v59 }
 0x1a4   : > { %v526_v0 = vmul.f32 1.0614054, %v1139_v61  ;;  %v1141_v18 = vpop.eup %1140 }
 0x1a5   : > { %v527_v1 = vadd.f32 -1.4531521, %v525_v63  ;;  %v1143_v20 = vpop.eup %1142 }
 0x1a6   : > { %v528_v3 = vadd.f32 -1.4531521, %v526_v0 }
 0x1a7   : > { %v529_v5 = vmul.f32 %v1137_v59, %v527_v1 }
 0x1a8   : > { %v530_v6 = vmul.f32 %v1139_v61, %v528_v3 }
 0x1a9   : > { %v531_v7 = vadd.f32 1.4214138, %v529_v5 }
 0x1aa   : > { %v532_v8 = vadd.f32 1.4214138, %v530_v6 }
 0x1ab   : > { %v533_v9 = vmul.f32 %v1137_v59, %v531_v7 }
 0x1ac   : > { %v534_v10 = vmul.f32 %v1139_v61, %v532_v8 }
 0x1ad   : > { %v535_v11 = vadd.f32 -0.28449672, %v533_v9 }
 0x1ae   : > { %v536_v12 = vadd.f32 -0.28449672, %v534_v10 }
 0x1af   : > { %v537_v13 = vmul.f32 %v1137_v59, %v535_v11 }
 0x1b0   : > { %v538_v14 = vmul.f32 %v1139_v61, %v536_v12 }
 0x1b1   : > { %v539_v15 = vadd.f32 0.2548296, %v537_v13 }
 0x1b2   : > { %v540_v16 = vadd.f32 0.2548296, %v538_v14 }
 0x1b3   : > { %v541_v17 = vmul.f32 %v1137_v59, %v539_v15 }
 0x1b4   : > { %v542_v19 = vmul.f32 %v1139_v61, %v540_v16 }
 0x1b5   : > { %v551_v21 = vmul.f32 %v1141_v18, %v541_v17 }
 0x1b6   : > { %v552_v22 = vmul.f32 %v1143_v20, %v542_v19 }
 0x1b7   : > { %v553_v23 = vsub.f32 1.0, %v551_v21 }
 0x1b8   : > { %v554_v26 = vsub.f32 1.0, %v552_v22 }
 0x1b9   : > { %v555_v28 = vmul.f32 %v553_v23, %v513_v25 }
 0x1ba   : > { %v556_v29 = vmul.f32 %v554_v26, %v514_v27 }
 0x1bb   : > { %v557_v31 = vadd.f32 1.0, %v555_v28 }
 0x1bc   : > { %v558_v33 = vadd.f32 1.0, %v556_v29 }
 0x1bd   : > { %v559_v34 = vmul.f32 %v557_v31, %v507_v30 }
 0x1be   : > { %v560_v35 = vmul.f32 %v558_v33, %v508_v32 }
 0x1bf   : > { %v562_v37 = vpack.c.bf16 %v559_v34, %v559_v34 }
 0x1c0   : > { %v563_v36 = vpack.c.bf16 %v560_v35, %v560_v35 }
 0x1c2   : > { %724 = vmatprep.mubr.bf16.mxu1 %v563_v36 }
 0x1c3   : > { %725 = vmatmul.mubr.bf16.vlgmr.msra.gmra.mrb[0].mxu1 %v562_v37 }
 0x296   : > { %v970_v38 = vpop.f32.mrb[0].mxu1  ;;  %737 = sbr.rel (%p946_p0) target bundleno = 679 (0x2a7), region = 60 }
 0x297   : > { %v971_v40 = vpop.f32.mrb[1].mxu1 }
 0x298   : > { %v972_v41 = vadd.f32 %v971_v40, %v970_v38  ;;  %v973_v42 = vpop.f32.mrb[2].mxu1 }
 0x299   : > { %v974_v43 = vpop.f32.mrb[3].mxu1 }
 0x29a   : > { %v732_v45 = vadd.f32 %v972_v41, %v561_v39 }
 0x29c   : > { %733 = vst [vmem:[#allocation2] sm:$0xff] %v732_v45 }
 0x2a3   : > { %v738_v44 = vld [vmem:[#allocation2] sm:$0xff] }
 0x2a4   : > { %v746_v47 = vadd.f32 %v947_v46, %v738_v44 }
 0x2a6   : > { %747 = vst [vmem:[%s1690_s18] sm:$0xff] %v746_v47 }
 0x2a7 PF: > { %s1844_s17 = sld [smem:[#allocation14_spill]]  ;;  %s1845_s4 = sld [smem:[#allocation23_spill]] }
 0x2a8   : > { %s762_s24 = sshll.u32 %s1690_s18, 4  ;;  %s749_s1 = scalar_lea.sflag [#allocation5], %s1663_s13  ;;  %s763_s24 = int_to_ptr.vmem [resolvable:$true] %s762_s24 }
 0x2a9   : > { %s1234_s7 = scalar_lea.vmem %s763_s24, 128  ;;  %p1846_p13 = scmp.ne.s32.totalorder %s1832_s5, 0 }
 0x2aa   : > { %p1235_p3 = scmp.ne.s32.totalorder %s763_s24, %s1234_s7  ;;  %s1373_s25 = smov [#allocation9]  }
 0x2ab   : > { %s1238_s11 = sshll.u32 %s1373_s25, 4  ;;  %s1239_s11 = int_to_ptr.vmem [resolvable:$false] %s1238_s11 }
 0x2ac   : > { %p1236_p9 = pnand %p1235_p3, %p1846_p13  ;;  %s1240_s30 = scalar_lea.vmem %s1239_s11, 256 }
 0x2ad   : > { %s949_s12 = sshll.u32 %s1844_s17, 7  ;;  %p1241_p11 = scmp.lt.s32.totalorder %s763_s24, %s1239_s11 }
 0x2ae   : > { %s1740_s9 = scalar_lea.hbm %s1845_s4, %s949_s12  ;;  %p1237_p12 = pneg %p1236_p9 }
 0x2af   : > { %p1242_p2 = scmp.lt.s32.totalorder %s1240_s30, %s1234_s7 }
 0x2b1   : > { %p1243_p1 = por %p1242_p2, %p1241_p11 }
 0x2b3   : > { %p1244_p5 = pnand %p1243_p1, %p1237_p12 }
 0x2b5   : > { %1247 = shalt.err (!%p1244_p5)
}
 0x2b6   : > { %s1248_s13 = scalar_lea.hbm %s1740_s9, 128  ;;  %s1252_s29 = scalar_lea.hbm %s1845_s4, 256 }
 0x2b7   : > { %p1249_p7 = scmp.ne.s32.totalorder %s1740_s9, %s1248_s13  ;;  %p1253_p10 = scmp.lt.u32.totalorder %s1740_s9, %s1845_s4 }
 0x2b8   : > { %p1254_p6 = scmp.lt.u32.totalorder %s1252_s29, %s1248_s13  ;;  %p1256_p3 = scmp.lt.u32.totalorder %s1248_s13, %s1740_s9 }
 0x2b9   : > { %p1250_p8 = pnand %p1249_p7, %p1846_p13 }
 0x2ba   : > { %p1255_p0 = por %p1254_p6, %p1253_p10 }
 0x2bb   : > { %p1251_p4 = pneg %p1250_p8 }
 0x2bc   : > { %p1257_p9 = por %p1256_p3, %p1255_p0 }
 0x2be   : > { %p1258_p12 = pnand %p1257_p9, %p1251_p4 }
 0x2c0   : > { %1261 = shalt.err (!%p1258_p12)
}
 0x2c1   : > { %982 = dma.vmem_to_hbm [thread:$0]  (%p1846_p13), %s763_s24, 128, %s1740_s9, %s749_s1  }
 0x2c2 PF: > { %p999_p11 = scmp.ge.s32.totalorder %s1360_s28, 2  ;;  %s774_s16 = sand.u32 1, %s1332_s21  }
 0x2c3   : > { %p1847_p2 = scmp.ne.s32.totalorder %s1833_s6, 0  ;;  %s775_s27 = scalar_lea.sflag [#allocation5], %s774_s16 }
 0x2c5   : > { %p995_p1 = pnand %p999_p11, %p1847_p2 }
 0x2c7   : > { %1315 = dma.done.wait (!%p995_p1), %s775_s27, 128  }
 0x2c8   : > { %1317 = vsyncadd (!%p995_p1), %s775_s27, 4294967168  ;;  %s24_s28 = sadd.s32 1, %s1360_s28   ;;  %s1848_s8 = sld [smem:[#allocation18_spill]] }
 0x2c9   : > { %p21_p5 = scmp.ge.s32.totalorder %s24_s28, 6   ;;  %s1849_s5 = sld [smem:[#allocation13_spill]] }
 0x2ca   : > { %s1850_s23 = sld [smem:[#allocation19_spill]]  ;;  %s1851_s25 = sld [smem:[#allocation15_spill]] }
 0x2cb   : > { %s1852_s17 = sld [smem:[#allocation16_spill]]  ;;  %s1853_s27 = sld [smem:[#allocation17_spill]] }
 0x2cc   : > { %s1854_s18 = smov %s1324_s19  ;;  %s1855_s19 = smov %s1328_s20 }
 0x2cd   : > { %s1857_s21 = smov %s1336_s22  ;;  %s1859_s24 = smov %s1352_s26 }
 0x2ce   : > { %s1856_s20 = smov %s1848_s8  ;;  %23 = sbr.rel (!%p21_p5) target bundleno = 16 (0x10), region = 120 }
 0x2cf   : > { %s1858_s22 = smov %s1849_s5 }
 0x2d1   : > { %s1860_s26 = smov %s1852_s17 }
 0x2d5   :  { %780 = vsyncpa [#allocation4], 1 }
 0x2d6   :  { %782 = vsyncpa [#allocation4 + $0x1], 1 }
 0x2d7   :  { %783 = vsyncpa [#allocation7], 1 }
 0x2d8   :  { %785 = vsyncpa [#allocation7 + $0x1], 1 }
 0x2d9   :  { %786 = vsyncpa [#allocation5], 1 }
 0x2da   :  { %788 = vsyncpa [#allocation5 + $0x1], 1 }

</bundles_post_ra>
